<compile_context>
chip_gen: v7x
topology: tpu7x:2x2x1
jax: 0.10.0
libtpu: 0.0.40
codegen_flags: <defaults>
</compile_context>

<pallas_src>
import jax
import jax.numpy as jnp
from jax.experimental import pallas as pl
from jax.experimental.pallas import tpu as pltpu


# ---------------------------------------------------------------------------
# Kernel
# ---------------------------------------------------------------------------
def _bimap_kernel(x_ref, w1_ref, w2_ref, o_ref):
    # x_ref : (hi, bt*ni, ni)   X slab for this batch tile, all input channels
    # w1_ref: (ho, hi, ni, no)  full Stiefel parameter (resident, constant index)
    # w2_ref: (ho, hi*ni, no)   same parameter with (ci, k) rows merged (stage 2)
    # o_ref : (ho, bt, no, no)
    hi, bt_ni, ni = x_ref.shape
    ho, hi_ni, no = w2_ref.shape
    bt = bt_ni // ni

    x = x_ref[...]  # loaded once, reused for every output channel

    # ho is small and static -> fully unrolled; every W slice below is a
    # leading-dim view (free), and each iteration is just two fused matmuls.
    for co in range(ho):
        # Stage 1 (one dot_general, batched over hi, whole batch tile at once):
        #   xw[c, b*ni + k, n] = sum_j X[b,c,k,j] * W[co,c,j,n]
        xw = jax.lax.dot_general(
            x, w1_ref[co],
            dimension_numbers=(((2,), (1,)), ((0,), (0,))),
            preferred_element_type=jnp.float32)              # (hi, bt*ni, no)

        # Bring the batch-tile index in front of (hi, ni) so (hi, ni) becomes a
        # single merged contraction axis for stage 2.  The sublane split is
        # layout-preserving when ni % 8 == 0; the transpose permutes leading
        # (untiled) dims only.
        xw = xw.reshape(hi, bt, ni, no)
        xw = jnp.transpose(xw, (1, 0, 2, 3)).reshape(bt, hi * ni, no)

        # Stage 2 (one dot_general, fused over hi*ni, batched over the batch tile):
        #   p[b, m, n] = sum_{c,k} W[co,c,k,m] * xw[b, c*ni + k, n]
        # TODO(synk): for very large hi*ni*no, replace the broadcast with a
        # multi-free-dim dot_general (kept to the safe batched-3D form here).
        w2 = jnp.broadcast_to(w2_ref[co][None], (bt, hi_ni, no))
        p = jax.lax.dot_general(
            w2, xw,
            dimension_numbers=(((1,), (1,)), ((0,), (0,))),
            preferred_element_type=jnp.float32)               # (bt, no, no)

        o_ref[co] = p.astype(o_ref.dtype)


# ---------------------------------------------------------------------------
# Padded, generation-aware VMEM sizing (review item: padded-tile math + TpuInfo)
# ---------------------------------------------------------------------------
def _round_up(x, m):
    return ((x + m - 1) // m) * m


def _padded_f32_bytes(*dims):
    """f32 VMEM footprint of a block: the last two dims pad to (8, 128) tiles."""
    lead = 1
    for d in dims[:-2]:
        lead *= d
    sub, lane = dims[-2], dims[-1]
    return lead * _round_up(sub, 8) * _round_up(lane, 128) * 4


def _vmem_capacity_bytes():
    try:
        cap = getattr(pltpu.get_tpu_info(), "vmem_capacity_bytes", None)
        if cap:
            return int(cap)
    except Exception:
        pass
    return 64 * 1024 * 1024  # conservative default: v7x per-TensorCore capacity


def _block_footprint_bytes(bt, hi, ho, ni, no):
    return (2 * _padded_f32_bytes(hi, bt * ni, ni)        # X block (double buffered)
            + 2 * _padded_f32_bytes(ho, hi, ni, no)       # W (stage-1 layout)
            + 2 * _padded_f32_bytes(ho, hi * ni, no)      # W (stage-2 layout)
            + 2 * _padded_f32_bytes(ho * bt, no, no)      # output block
            + _padded_f32_bytes(hi, bt * ni, no)          # stage-1 intermediate
            + 2 * _padded_f32_bytes(bt, hi * ni, no))     # stage-2 operands


def _pick_block_batch(batch, hi, ho, ni, no, budget_bytes):
    """Largest legal batch tile whose PADDED footprint fits the budget; prefers
    >=2 grid steps (v7x megacore) once per-step work is already substantial."""
    divisors = [d for d in range(1, batch + 1) if batch % d == 0]
    # (8,128) rule: the second-to-last X block dim (bt*ni) must be a multiple of
    # 8 or equal to the full array dim (bt == batch).
    legal = [d for d in divisors if (d * ni) % 8 == 0 or d == batch]
    fits = [d for d in legal if _block_footprint_bytes(d, hi, ho, ni, no) <= budget_bytes]
    if not fits:
        fits = [min(legal)]
    bt = max(fits)
    for d in sorted(fits):
        if d * ni >= 256 and batch // d >= 2:
            bt = d
            break
    return bt


# ---------------------------------------------------------------------------
# Wrapper
# ---------------------------------------------------------------------------
def bimap_channels(X, W, *, block_batch=None):
    """X: (batch, hi, ni, ni), W: (ho, hi, ni, no) -> (batch, ho, no, no)."""
    batch, hi, ni, ni2 = X.shape
    ho, hi_w, ni_w, no = W.shape
    assert ni == ni2 and hi == hi_w and ni == ni_w

    # TODO(synk): f64 not supported on TPU MXU -> compute in f32.
    X = X.astype(jnp.float32)
    W = W.astype(jnp.float32)

    vmem_cap = _vmem_capacity_bytes()
    budget = int(0.40 * vmem_cap)
    bt = block_batch if block_batch is not None else _pick_block_batch(
        batch, hi, ho, ni, no, budget)
    assert batch % bt == 0, "block_batch must divide batch"
    assert (bt * ni) % 8 == 0 or bt == batch, "batch tile violates the (8,128) rule"
    nbt = batch // bt

    footprint = _block_footprint_bytes(bt, hi, ho, ni, no)
    vmem_limit = min(int(0.9 * vmem_cap), max(32 * 1024 * 1024, 2 * footprint))

    # Wrapper-side layout plumbing (HBM only; no in-kernel ref reshapes):
    #   X -> (hi, batch*ni, ni); W additionally as (ho, hi*ni, no) for stage 2.
    X_s = jnp.transpose(X, (1, 0, 2, 3)).reshape(hi, batch * ni, ni)
    W2 = W.reshape(ho, hi * ni, no)

    out = pl.pallas_call(
        _bimap_kernel,
        out_shape=jax.ShapeDtypeStruct((ho, batch, no, no), jnp.float32),
        grid_spec=pltpu.PrefetchScalarGridSpec(
            num_scalar_prefetch=0,
            grid=(nbt,),
            in_specs=[
                # X slab: all hi channels for bt batch rows; varies with the grid.
                pl.BlockSpec((hi, bt * ni, ni), lambda i: (0, i, 0)),
                # W (both layouts): constant index map -> fetched once, resident.
                pl.BlockSpec((ho, hi, ni, no), lambda i: (0, 0, 0, 0)),
                pl.BlockSpec((ho, hi * ni, no), lambda i: (0, 0, 0)),
            ],
            out_specs=pl.BlockSpec((ho, bt, no, no), lambda i: (0, i, 0, 0)),
        ),
        compiler_params=pltpu.CompilerParams(
            dimension_semantics=("parallel",),
            vmem_limit_bytes=vmem_limit,
        ),
    )(X_s, W, W2)

    # (ho, batch, no, no) -> (batch, ho, no, no): wrapper-side layout plumbing.
    return jnp.transpose(out, (1, 0, 2, 3))


# ---------------------------------------------------------------------------
# Parameter init + reference
# ---------------------------------------------------------------------------
def init_bimap_parameter(key, ho, hi, ni, no, dtype=jnp.float32):
    """Deterministic Stiefel init: orthonormal columns per (ho, hi) slice via QR."""
    A = jax.random.normal(key, (ho, hi, ni, ni), dtype=dtype)
    Q, _ = jnp.linalg.qr(A)            # orthonormal columns per (ho, hi) slice
    return Q[..., :no]                 # (ho, hi, ni, no)


def bimap_reference(X, W):
    # P[b, co] = sum_ci W[co,ci]^T X[b,ci] W[co,ci]
    return jnp.einsum("ocnm,bcnk,ocks->boms", W, X, W)


if __name__ == "__main__":
    batch, hi, ho, ni, no = 2, 4, 3, 16, 8
    key = jax.random.PRNGKey(0)
    kx, kw = jax.random.split(key)

    # Symmetric positive definite inputs X
    A = jax.random.normal(kx, (batch, hi, ni, ni), dtype=jnp.float32)
    X = jnp.einsum("bcij,bckj->bcik", A, A) + 1e-2 * jnp.eye(ni, dtype=jnp.float32)

    W = init_bimap_parameter(kw, ho, hi, ni, no, dtype=jnp.float32)

    P = bimap_channels(X, W)
    P = jax.block_until_ready(P)

    P_ref = bimap_reference(X, W)
    assert P.shape == (batch, ho, no, no)
    assert jnp.allclose(P, P_ref, rtol=2e-4, atol=2e-3), "mismatch vs reference"

    print("KERNEL_OK")
</pallas_src>

<mosaic_0001>
module attributes {stable_mosaic.version = 11 : i64} {
  func.func @_bimap_kernel(%arg0: i32, %arg1: memref<4x32x16xf32, #tpu.memory_space<vmem>>, %arg2: memref<3x4x16x8xf32, #tpu.memory_space<vmem>>, %arg3: memref<3x64x8xf32, #tpu.memory_space<vmem>>, %arg4: memref<3x2x8x8xf32, #tpu.memory_space<vmem>>) attributes {dimension_semantics = [#tpu.dimension_semantics<parallel>], iteration_bounds = array<i64: 1>, scalar_prefetch = 0 : i64, scratch_operands = 0 : i64, tpu.core_type = #tpu.core_type<tc>, window_params = [{transform_indices = @transform_0, window_bounds = array<i64: 4, 32, 16>}, {pipeline_mode = #tpu.pipeline_mode<synchronous>, transform_indices = @transform_1, window_bounds = array<i64: 3, 4, 16, 8>}, {pipeline_mode = #tpu.pipeline_mode<synchronous>, transform_indices = @transform_2, window_bounds = array<i64: 3, 64, 8>}, {transform_indices = @transform_3, window_bounds = array<i64: 3, 2, 8, 8>}]} {
    %c0 = arith.constant 0 : index
    %c0_0 = arith.constant 0 : index
    %c0_1 = arith.constant 0 : index
    %0 = vector.load %arg1[%c0, %c0_0, %c0_1] : memref<4x32x16xf32, #tpu.memory_space<vmem>>, vector<4x32x16xf32>
    %c0_2 = arith.constant 0 : index
    %c0_3 = arith.constant 0 : index
    %c0_4 = arith.constant 0 : index
    %c0_5 = arith.constant 0 : index
    %1 = vector.load %arg2[%c0_2, %c0_3, %c0_4, %c0_5] : memref<3x4x16x8xf32, #tpu.memory_space<vmem>>, vector<1x4x16x8xf32>
    %2 = vector.shape_cast %1 : vector<1x4x16x8xf32> to vector<4x16x8xf32>
    %cst = arith.constant dense<0.000000e+00> : vector<4x32x8xf32>
    %3 = tpu.matmul %0, %2, %cst {dimension_numbers = #tpu.dot_dimension_numbers<[2], [1], [1], [2], [0, 0, 0, 1, 1, 2], [0], [0]>} : vector<4x32x16xf32>, vector<4x16x8xf32>, vector<4x32x8xf32> -> vector<4x32x8xf32>
    %4 = vector.shape_cast %3 : vector<4x32x8xf32> to vector<4x2x16x8xf32>
    %5 = tpu.transpose %4, [1, 0, 2, 3] : vector<4x2x16x8xf32> -> vector<2x4x16x8xf32>
    %6 = vector.shape_cast %5 : vector<2x4x16x8xf32> to vector<2x64x8xf32>
    %c0_6 = arith.constant 0 : index
    %c0_7 = arith.constant 0 : index
    %c0_8 = arith.constant 0 : index
    %7 = vector.load %arg3[%c0_6, %c0_7, %c0_8] : memref<3x64x8xf32, #tpu.memory_space<vmem>>, vector<1x64x8xf32>
    %8 = vector.shape_cast %7 : vector<1x64x8xf32> to vector<64x8xf32>
    %9 = vector.shape_cast %8 : vector<64x8xf32> to vector<1x64x8xf32>
    %10 = vector.shape_cast %9 : vector<1x64x8xf32> to vector<1x64x8xf32>
    %11 = vector.broadcast %10 : vector<1x64x8xf32> to vector<2x64x8xf32>
    %cst_9 = arith.constant dense<0.000000e+00> : vector<2x8x8xf32>
    %12 = tpu.matmul %11, %6, %cst_9 {dimension_numbers = #tpu.dot_dimension_numbers<[1], [1], [2], [2], [0, 0, 0, 2, 1, 2], [0], [0]>} : vector<2x64x8xf32>, vector<2x64x8xf32>, vector<2x8x8xf32> -> vector<2x8x8xf32>
    %c0_10 = arith.constant 0 : index
    %c0_11 = arith.constant 0 : index
    %c0_12 = arith.constant 0 : index
    %c0_13 = arith.constant 0 : index
    %13 = vector.load %arg4[%c0_10, %c0_11, %c0_12, %c0_13] : memref<3x2x8x8xf32, #tpu.memory_space<vmem>>, vector<1x2x8x8xf32>
    %14 = vector.shape_cast %13 : vector<1x2x8x8xf32> to vector<2x8x8xf32>
    %15 = vector.shape_cast %12 : vector<2x8x8xf32> to vector<1x2x8x8xf32>
    tpu.vector_store %arg4[%c0_10, %c0_11, %c0_12, %c0_13], %15 {strides = array<i32>} : memref<3x2x8x8xf32, #tpu.memory_space<vmem>>, vector<1x2x8x8xf32>,
    %c1 = arith.constant 1 : index
    %c0_14 = arith.constant 0 : index
    %c0_15 = arith.constant 0 : index
    %c0_16 = arith.constant 0 : index
    %16 = vector.load %arg2[%c1, %c0_14, %c0_15, %c0_16] : memref<3x4x16x8xf32, #tpu.memory_space<vmem>>, vector<1x4x16x8xf32>
    %17 = vector.shape_cast %16 : vector<1x4x16x8xf32> to vector<4x16x8xf32>
    %cst_17 = arith.constant dense<0.000000e+00> : vector<4x32x8xf32>
    %18 = tpu.matmul %0, %17, %cst_17 {dimension_numbers = #tpu.dot_dimension_numbers<[2], [1], [1], [2], [0, 0, 0, 1, 1, 2], [0], [0]>} : vector<4x32x16xf32>, vector<4x16x8xf32>, vector<4x32x8xf32> -> vector<4x32x8xf32>
    %19 = vector.shape_cast %18 : vector<4x32x8xf32> to vector<4x2x16x8xf32>
    %20 = tpu.transpose %19, [1, 0, 2, 3] : vector<4x2x16x8xf32> -> vector<2x4x16x8xf32>
    %21 = vector.shape_cast %20 : vector<2x4x16x8xf32> to vector<2x64x8xf32>
    %c1_18 = arith.constant 1 : index
    %c0_19 = arith.constant 0 : index
    %c0_20 = arith.constant 0 : index
    %22 = vector.load %arg3[%c1_18, %c0_19, %c0_20] : memref<3x64x8xf32, #tpu.memory_space<vmem>>, vector<1x64x8xf32>
    %23 = vector.shape_cast %22 : vector<1x64x8xf32> to vector<64x8xf32>
    %24 = vector.shape_cast %23 : vector<64x8xf32> to vector<1x64x8xf32>
    %25 = vector.shape_cast %24 : vector<1x64x8xf32> to vector<1x64x8xf32>
    %26 = vector.broadcast %25 : vector<1x64x8xf32> to vector<2x64x8xf32>
    %cst_21 = arith.constant dense<0.000000e+00> : vector<2x8x8xf32>
    %27 = tpu.matmul %26, %21, %cst_21 {dimension_numbers = #tpu.dot_dimension_numbers<[1], [1], [2], [2], [0, 0, 0, 2, 1, 2], [0], [0]>} : vector<2x64x8xf32>, vector<2x64x8xf32>, vector<2x8x8xf32> -> vector<2x8x8xf32>
    %c1_22 = arith.constant 1 : index
    %c0_23 = arith.constant 0 : index
    %c0_24 = arith.constant 0 : index
    %c0_25 = arith.constant 0 : index
    %28 = vector.load %arg4[%c1_22, %c0_23, %c0_24, %c0_25] : memref<3x2x8x8xf32, #tpu.memory_space<vmem>>, vector<1x2x8x8xf32>
    %29 = vector.shape_cast %28 : vector<1x2x8x8xf32> to vector<2x8x8xf32>
    %30 = vector.shape_cast %27 : vector<2x8x8xf32> to vector<1x2x8x8xf32>
    tpu.vector_store %arg4[%c1_22, %c0_23, %c0_24, %c0_25], %30 {strides = array<i32>} : memref<3x2x8x8xf32, #tpu.memory_space<vmem>>, vector<1x2x8x8xf32>,
    %c2 = arith.constant 2 : index
    %c0_26 = arith.constant 0 : index
    %c0_27 = arith.constant 0 : index
    %c0_28 = arith.constant 0 : index
    %31 = vector.load %arg2[%c2, %c0_26, %c0_27, %c0_28] : memref<3x4x16x8xf32, #tpu.memory_space<vmem>>, vector<1x4x16x8xf32>
    %32 = vector.shape_cast %31 : vector<1x4x16x8xf32> to vector<4x16x8xf32>
    %cst_29 = arith.constant dense<0.000000e+00> : vector<4x32x8xf32>
    %33 = tpu.matmul %0, %32, %cst_29 {dimension_numbers = #tpu.dot_dimension_numbers<[2], [1], [1], [2], [0, 0, 0, 1, 1, 2], [0], [0]>} : vector<4x32x16xf32>, vector<4x16x8xf32>, vector<4x32x8xf32> -> vector<4x32x8xf32>
    %34 = vector.shape_cast %33 : vector<4x32x8xf32> to vector<4x2x16x8xf32>
    %35 = tpu.transpose %34, [1, 0, 2, 3] : vector<4x2x16x8xf32> -> vector<2x4x16x8xf32>
    %36 = vector.shape_cast %35 : vector<2x4x16x8xf32> to vector<2x64x8xf32>
    %c2_30 = arith.constant 2 : index
    %c0_31 = arith.constant 0 : index
    %c0_32 = arith.constant 0 : index
    %37 = vector.load %arg3[%c2_30, %c0_31, %c0_32] : memref<3x64x8xf32, #tpu.memory_space<vmem>>, vector<1x64x8xf32>
    %38 = vector.shape_cast %37 : vector<1x64x8xf32> to vector<64x8xf32>
    %39 = vector.shape_cast %38 : vector<64x8xf32> to vector<1x64x8xf32>
    %40 = vector.shape_cast %39 : vector<1x64x8xf32> to vector<1x64x8xf32>
    %41 = vector.broadcast %40 : vector<1x64x8xf32> to vector<2x64x8xf32>
    %cst_33 = arith.constant dense<0.000000e+00> : vector<2x8x8xf32>
    %42 = tpu.matmul %41, %36, %cst_33 {dimension_numbers = #tpu.dot_dimension_numbers<[1], [1], [2], [2], [0, 0, 0, 2, 1, 2], [0], [0]>} : vector<2x64x8xf32>, vector<2x64x8xf32>, vector<2x8x8xf32> -> vector<2x8x8xf32>
    %c2_34 = arith.constant 2 : index
    %c0_35 = arith.constant 0 : index
    %c0_36 = arith.constant 0 : index
    %c0_37 = arith.constant 0 : index
    %43 = vector.load %arg4[%c2_34, %c0_35, %c0_36, %c0_37] : memref<3x2x8x8xf32, #tpu.memory_space<vmem>>, vector<1x2x8x8xf32>
    %44 = vector.shape_cast %43 : vector<1x2x8x8xf32> to vector<2x8x8xf32>
    %45 = vector.shape_cast %42 : vector<2x8x8xf32> to vector<1x2x8x8xf32>
    tpu.vector_store %arg4[%c2_34, %c0_35, %c0_36, %c0_37], %45 {strides = array<i32>} : memref<3x2x8x8xf32, #tpu.memory_space<vmem>>, vector<1x2x8x8xf32>,
    return
  }
  func.func @transform_0(%arg0: i32) -> (i32, i32, i32) {
    %c0_i32 = arith.constant 0 : i32
    %c0_i32_0 = arith.constant 0 : i32
    %c0_i32_1 = arith.constant 0 : i32
    return %c0_i32, %arg0, %c0_i32_0 : i32, i32, i32
  }
  func.func @transform_1(%arg0: i32) -> (i32, i32, i32, i32) {
    %c0_i32 = arith.constant 0 : i32
    %c0_i32_0 = arith.constant 0 : i32
    %c0_i32_1 = arith.constant 0 : i32
    %c0_i32_2 = arith.constant 0 : i32
    %c0_i32_3 = arith.constant 0 : i32
    return %c0_i32, %c0_i32_0, %c0_i32_1, %c0_i32_2 : i32, i32, i32, i32
  }
  func.func @transform_2(%arg0: i32) -> (i32, i32, i32) {
    %c0_i32 = arith.constant 0 : i32
    %c0_i32_0 = arith.constant 0 : i32
    %c0_i32_1 = arith.constant 0 : i32
    %c0_i32_2 = arith.constant 0 : i32
    return %c0_i32, %c0_i32_0, %c0_i32_1 : i32, i32, i32
  }
  func.func @transform_3(%arg0: i32) -> (i32, i32, i32, i32) {
    %c0_i32 = arith.constant 0 : i32
    %c0_i32_0 = arith.constant 0 : i32
    %c0_i32_1 = arith.constant 0 : i32
    %c0_i32_2 = arith.constant 0 : i32
    return %c0_i32, %arg0, %c0_i32_0, %c0_i32_1 : i32, i32, i32, i32
  }
}

</mosaic_0001>

<bundles_post_ra>
// kernel: tpu_custom_call.1
= control target key start
LH: loop header
LB: loop body
LE: loop exit
PB: predicated region body
PF: predicated region fallthrough
CT: control target
= control target key end

     0   :  { %vm39_vm0 = vcmask 130048   ;;  %s2705_s0 = inlined_call_operand.vmem [shape: f32[4,32,16], index: 0, kind: input, shape index: {}]   ;;  %s2706_s1 = inlined_call_operand.vmem [shape: f32[3,4,16,8], index: 1, kind: input, shape index: {}]   ;;  %s2707_s2 = inlined_call_operand.vmem [shape: f32[3,64,8], index: 2, kind: input, shape index: {}]   ;;  %s2708_s3 = inlined_call_operand.hbm [shape: f32[3,2,8,8], index: 3, kind: output, shape index: {}]  }
   0x1   :  { %v31_v0 = vld [vmem:[%s2706_s1] sm:$0xff]  ;;  %v32_v1 = vld [vmem:[%s2706_s1 + $0x8] sm:$0xff]  ;;  %v33_v4 = vld [vmem:[%s2706_s1 + $0x10] sm:$0xff] }
   0x2   :  { %v2334_v2 = vld [vmem:[%s2705_s0] sm:$0xff]  ;;  %v2149_v3 = vpack.c.bf16 %v32_v1, %v31_v0  ;;  %v34_v5 = vld [vmem:[%s2706_s1 + $0x18] sm:$0xff]  ;;  %v36_v8 = vld [vmem:[%s2706_s1 + $0x28] sm:$0xff] }
   0x3   :  { %1919 = vmatprep.mubr.msk.f32.mxu0 %vm39_vm0, %v2334_v2  ;;  %v2153_v6 = vpack.c.bf16 %v34_v5, %v33_v4  ;;  %v35_v7 = vld [vmem:[%s2706_s1 + $0x20] sm:$0xff]  ;;  %v2360_v11 = vld [vmem:[%s2705_s0 + $0x8] sm:$0xff]  ;;  %v37_v12 = vld [vmem:[%s2706_s1 + $0x30] sm:$0xff] }
   0x4   :  { %v2353_v9 = vld [vmem:[%s2705_s0 + $0x20] sm:$0xff]  ;;  %2150 = vmatprep.subr.bf16.mxu0 %v2149_v3  ;;  %v2157_v10 = vpack.c.bf16 %v36_v8, %v35_v7  ;;  %v38_v13 = vld [vmem:[%s2706_s1 + $0x38] sm:$0xff]  ;;  %v2371_v14 = vld [vmem:[%s2705_s0 + $0x10] sm:$0xff] }
   0x5   :  { %1929 = vmatprep.mubr.msk.f32.mxu1 %vm39_vm0, %v2353_v9  ;;  %2152 = vmatpush3.bf16.msra.mxu0 %v2149_v3  ;;  %v2161_v15 = vpack.c.bf16 %v38_v13, %v37_v12  ;;  %v2376_v16 = vld [vmem:[%s2705_s0 + $0x28] sm:$0xff]  ;;  %v2383_v17 = vld [vmem:[%s2705_s0 + $0x30] sm:$0xff]  ;;  %v2390_v18 = vld [vmem:[%s2705_s0 + $0x18] sm:$0xff] }
   0x6   :  { %2154 = vmatprep.subr.bf16.mxu1 %v2153_v6  ;;  %2158 = vmatprep.subr.bf16.mxu0 %v2157_v10  ;;  %v428_v19 = vld [vmem:[%s2707_s2] sm:$0xff]  ;;  %v2407_v21 = vld [vmem:[%s2705_s0 + $0x38] sm:$0xff]  ;;  %v429_v22 = vld [vmem:[%s2707_s2 + $0x8] sm:$0xff] }
   0x7   :  { %2156 = vmatpush3.bf16.msra.mxu1 %v2153_v6  ;;  %v2400_v20 = vld [vmem:[%s2705_s0 + $0x40] sm:$0xff]  ;;  %436 = vxpose.xlu0.b32.start [1/8] (short) (narrow) %v428_v19, 8 }
   0x8   :  { %1920 = vmatmul.mubr.msk.f32.vlgmr.msra.gmra.mrb[0].mxu0 %vm39_vm0, %v2360_v11  ;;  %2162 = vmatprep.subr.bf16.mxu1 %v2161_v15 }
   0x9   :  { %2160 = vmatpush3.bf16.msra.mxu0 %v2157_v10  ;;  %1922 = vmatprep.mubr.msk.f32.mxu0 %vm39_vm0, %v2371_v14 }
   0xa   :  { %1930 = vmatmul.mubr.msk.f32.vlgmr.msra.gmra.mrb[0].mxu1 %vm39_vm0, %v2376_v16 }
   0xb   :  { %2164 = vmatpush3.bf16.msra.mxu1 %v2161_v15  ;;  %1932 = vmatprep.mubr.msk.f32.mxu1 %vm39_vm0, %v2383_v17 }
   0xc   :  { %8 = vsyncpa [#allocation3], 0  ;;  %1923 = vmatmul.mubr.msk.f32.gmra.mrb[2].mxu0 %vm39_vm0, %v2390_v18  ;;  %v2417_v23 = vld [vmem:[%s2705_s0 + $0x60] sm:$0xff]  ;;  %v2424_v24 = vld [vmem:[%s2705_s0 + $0x48] sm:$0xff]  ;;  %437 = vxpose.xlu0.b32.cont [2/8] (short) (narrow) %v429_v22, 8  ;;  %v2299_v36 = vmov 0.0|0.0  }
   0xd   :  { %1939 = vmatprep.mubr.msk.f32.mxu0 %vm39_vm0, %v2400_v20  ;;  %v2431_v25 = vld [vmem:[%s2705_s0 + $0x50] sm:$0xff]  ;;  %v2438_v26 = vld [vmem:[%s2705_s0 + $0x68] sm:$0xff]  ;;  %v2455_v29 = vld [vmem:[%s2705_s0 + $0x58] sm:$0xff]  ;;  %2165 = vmatprep.subr.bf16.mxu0 %v2299_v36  ;;  %vm2300_vm1 = vmmov 0   ;;  %v2301_v37 = vmov 0.0   ;;  %vm468_vm2 = vcmask 523264  }
   0xe   :  { %1933 = vmatmul.mubr.msk.f32.gmra.mrb[2].mxu1 %vm39_vm0, %v2407_v21  ;;  %v430_v27 = vld [vmem:[%s2707_s2 + $0x10] sm:$0xff]  ;;  %v2464_v30 = vld [vmem:[%s2705_s0 + $0x78] sm:$0xff]  ;;  %v432_v32 = vld [vmem:[%s2707_s2 + $0x20] sm:$0xff]  ;;  %2177 = vmatprep.subr.bf16.mxu1 %v2299_v36  ;;  %vm612_vm3 = vcmask 64512  }
   0xf   :  { %1949 = vmatprep.mubr.msk.f32.mxu1 %vm39_vm0, %v2417_v23  ;;  %v2448_v28 = vld [vmem:[%s2705_s0 + $0x70] sm:$0xff]  ;;  %v431_v31 = vld [vmem:[%s2707_s2 + $0x18] sm:$0xff]  ;;  %v433_v33 = vld [vmem:[%s2707_s2 + $0x28] sm:$0xff] }
  0x10   :  { %1940 = vmatmul.mubr.msk.f32.vlgmr.msra.gmra.mrb[4].mxu0 %vm39_vm0, %v2424_v24  ;;  %438 = vxpose.xlu0.b32.cont [3/8] (short) (narrow) %v430_v27, 8  ;;  %v434_v34 = vld [vmem:[%s2707_s2 + $0x30] sm:$0xff]  ;;  %v435_v35 = vld [vmem:[%s2707_s2 + $0x38] sm:$0xff]  ;;  %v1745_v38 = vld [vmem:[%s2707_s2 + $0x40] sm:$0xff] }
  0x11   :  { %1942 = vmatprep.mubr.msk.f32.mxu0 %vm39_vm0, %v2431_v25  ;;  %973 = vxpose.xlu1.b32.start [1/8] (short) (narrow) %v1745_v38, 8  ;;  %v1746_v39 = vld [vmem:[%s2707_s2 + $0x48] sm:$0xff]  ;;  %v1747_v40 = vld [vmem:[%s2707_s2 + $0x50] sm:$0xff]  ;;  %v1748_v41 = vld [vmem:[%s2707_s2 + $0x58] sm:$0xff] }
  0x12   :  { %1950 = vmatmul.mubr.msk.f32.vlgmr.msra.gmra.mrb[4].mxu1 %vm39_vm0, %v2438_v26  ;;  %v1749_v42 = vld [vmem:[%s2707_s2 + $0x60] sm:$0xff]  ;;  %v1750_v43 = vld [vmem:[%s2707_s2 + $0x68] sm:$0xff]  ;;  %v1751_v44 = vld [vmem:[%s2707_s2 + $0x70] sm:$0xff] }
  0x13   :  { %1952 = vmatprep.mubr.msk.f32.mxu1 %vm39_vm0, %v2448_v28  ;;  %v1752_v45 = vld [vmem:[%s2707_s2 + $0x78] sm:$0xff]  ;;  %v1721_v62 = vld [vmem:[%s2706_s1 + $0x40] sm:$0xff]  ;;  %v1722_v63 = vld [vmem:[%s2706_s1 + $0x48] sm:$0xff] }
  0x14   :  { %1943 = vmatmul.mubr.msk.f32.gmra.mrb[6].mxu0 %vm39_vm0, %v2455_v29  ;;  %439 = vxpose.xlu0.b32.cont [4/8] (short) (narrow) %v431_v31, 8  ;;  %v2189_v5 = vpack.c.bf16 %v1722_v63, %v1721_v62  ;;  %v1723_v8 = vld [vmem:[%s2706_s1 + $0x50] sm:$0xff]  ;;  %v1724_v10 = vld [vmem:[%s2706_s1 + $0x58] sm:$0xff]  ;;  %v1725_v13 = vld [vmem:[%s2706_s1 + $0x60] sm:$0xff] }
  0x15   :  { %1971 = vmatprep.mubr.msk.f32.mxu0 %vm2300_vm1, %v2301_v37  ;;  %974 = vxpose.xlu1.b32.cont [2/8] (short) (narrow) %v1746_v39, 8  ;;  %v1726_v15 = vld [vmem:[%s2706_s1 + $0x68] sm:$0xff]  ;;  %v2193_v27 = vpack.c.bf16 %v1724_v10, %v1723_v8  ;;  %v1781_v39 = vld [vmem:[%s2707_s2 + $0x90] sm:$0xff] }
  0x16   :  { %1953 = vmatmul.mubr.msk.f32.gmra.mrb[6].mxu1 %vm39_vm0, %v2464_v30  ;;  %v2197_v31 = vpack.c.bf16 %v1726_v15, %v1725_v13  ;;  %v1780_v38 = vld [vmem:[%s2707_s2 + $0x88] sm:$0xff]  ;;  %v1758_v13 = vld [vmem:[%s2706_s1 + $0x98] sm:$0xff]  ;;  %v1759_v15 = vld [vmem:[%s2706_s1 + $0xa0] sm:$0xff] }
  0x17   :  { %1990 = vmatprep.mubr.msk.f32.mxu1 %vm2300_vm1, %v2301_v37 }
  0x18   :  { %440 = vxpose.xlu0.b32.cont [5/8] (short) (narrow) %v432_v32, 8  ;;  %v1727_v32 = vld [vmem:[%s2706_s1 + $0x70] sm:$0xff] }
  0x19   :  { %975 = vxpose.xlu1.b32.cont [3/8] (short) (narrow) %v1747_v40, 8  ;;  %v1782_v40 = vld [vmem:[%s2707_s2 + $0x98] sm:$0xff] }
  0x1c   :  { %441 = vxpose.xlu0.b32.cont [6/8] (short) (narrow) %v433_v33, 8  ;;  %v1728_v33 = vld [vmem:[%s2706_s1 + $0x78] sm:$0xff] }
  0x1d   :  { %976 = vxpose.xlu1.b32.cont [4/8] (short) (narrow) %v1748_v41, 8  ;;  %v1783_v41 = vld [vmem:[%s2707_s2 + $0xa0] sm:$0xff] }
  0x20   :  { %442 = vxpose.xlu0.b32.cont [7/8] (short) (narrow) %v434_v34, 8  ;;  %v2201_v34 = vpack.c.bf16 %v1728_v33, %v1727_v32 }
  0x21   :  { %977 = vxpose.xlu1.b32.cont [5/8] (short) (narrow) %v1749_v42, 8  ;;  %v1784_v42 = vld [vmem:[%s2707_s2 + $0xa8] sm:$0xff] }
  0x24   :  { %443 = vxpose.xlu0.b32.end [8/8] (short) (narrow) %v435_v35, 8  ;;  %v1779_v35 = vld [vmem:[%s2707_s2 + $0x80] sm:$0xff] }
  0x25   :  { %978 = vxpose.xlu1.b32.cont [6/8] (short) (narrow) %v1750_v43, 8  ;;  %v1785_v43 = vld [vmem:[%s2707_s2 + $0xb0] sm:$0xff] }
  0x28   :  { %1509 = vxpose.xlu0.b32.start [1/8] (short) (narrow) %v1779_v35, 8  ;;  %v1761_v35 = vld [vmem:[%s2706_s1 + $0xb0] sm:$0xff] }
  0x29   :  { %979 = vxpose.xlu1.b32.cont [7/8] (short) (narrow) %v1751_v44, 8  ;;  %v1786_v44 = vld [vmem:[%s2707_s2 + $0xb8] sm:$0xff] }
  0x2c   :  { %1510 = vxpose.xlu0.b32.cont [2/8] (short) (narrow) %v1780_v38, 8  ;;  %v1762_v38 = vld [vmem:[%s2706_s1 + $0xb8] sm:$0xff] }
  0x2d   :  { %980 = vxpose.xlu1.b32.end [8/8] (short) (narrow) %v1752_v45, 8 }
  0x30   :  { %1511 = vxpose.xlu0.b32.cont [3/8] (short) (narrow) %v1781_v39, 8  ;;  %v2241_v39 = vpack.c.bf16 %v1762_v38, %v1761_v35 }
  0x34   :  { %1512 = vxpose.xlu0.b32.cont [4/8] (short) (narrow) %v1782_v40, 8 }
  0x38   :  { %1513 = vxpose.xlu0.b32.cont [5/8] (short) (narrow) %v1783_v41, 8 }
  0x3c   :  { %1514 = vxpose.xlu0.b32.cont [6/8] (short) (narrow) %v1784_v42, 8 }
  0x40   :  { %1515 = vxpose.xlu0.b32.cont [7/8] (short) (narrow) %v1785_v43, 8 }
  0x44   :  { %1516 = vxpose.xlu0.b32.end [8/8] (short) (narrow) %v1786_v44, 8 }
  0x88   :  { %v452_v22 = vpop.trf.xlu0 }
  0xdb   :  { %v1921_v46 = vpop.f32.mrb[0].mxu0 }
  0xdc   :  { %v118_v47 = vpop.f32.mrb[1].mxu0 }
  0xdd   :  { %v2166_v48 = vpack.c.bf16 %v1921_v46, %v118_v47  ;;  %v1931_v49 = vpop.f32.mrb[0].mxu1 }
  0xde   :  { %v215_v50 = vpop.f32.mrb[1].mxu1 }
  0xdf   :  { %v1924_v51 = vpop.f32.mrb[2].mxu0  ;;  %v2169_v52 = vpack.c.bf16 %v1931_v49, %v215_v50  ;;  %2167 = vmatpush3.bf16.msra.mxu0 %v2166_v48 }
  0xe0   :  { %v128_v53 = vpop.f32.mrb[3].mxu0  ;;  %2168 = vmatprep.subr.bf16.mxu0 %v2299_v36 }
  0xe1   :  { %v2178_v54 = vpack.c.bf16 %v1924_v51, %v128_v53  ;;  %v1934_v55 = vpop.f32.mrb[2].mxu1 }
  0xe2   :  { %v225_v56 = vpop.f32.mrb[3].mxu1 }
  0xe3   :  { %v2181_v57 = vpack.c.bf16 %v1934_v55, %v225_v56  ;;  %v1941_v58 = vpop.f32.mrb[4].mxu0  ;;  %2170 = vmatpush3.bf16.msra.mxu0 %v2169_v52  ;;  %2179 = vmatpush3.bf16.msra.mxu1 %v2178_v54 }
  0xe4   :  { %v312_v59 = vpop.f32.mrb[5].mxu0  ;;  %2171 = vmatprep.subr.bf16.mxu0 %v2299_v36  ;;  %2180 = vmatprep.subr.bf16.mxu1 %v2299_v36 }
  0xe5   :  { %v2172_v60 = vpack.c.bf16 %v1941_v58, %v312_v59  ;;  %v1951_v61 = vpop.f32.mrb[4].mxu1 }
  0xe6   :  { %v409_v0 = vpop.f32.mrb[5].mxu1 }
  0xe7   :  { %v1944_v1 = vpop.f32.mrb[6].mxu0  ;;  %v2175_v3 = vpack.c.bf16 %v1951_v61, %v409_v0  ;;  %2173 = vmatpush3.bf16.msra.mxu0 %v2172_v60  ;;  %2182 = vmatpush3.bf16.msra.mxu1 %v2181_v57  ;;  %v1755_v0 = vld [vmem:[%s2706_s1 + $0x80] sm:$0xff] }
  0xe8   :  { %v322_v4 = vpop.f32.mrb[7].mxu0  ;;  %2174 = vmatprep.subr.bf16.mxu0 %v2299_v36  ;;  %2183 = vmatprep.subr.bf16.mxu1 %v2299_v36 }
  0xe9   :  { %v2184_v6 = vpack.c.bf16 %v1944_v1, %v322_v4  ;;  %v1954_v7 = vpop.f32.mrb[6].mxu1  ;;  %v1756_v1 = vld [vmem:[%s2706_s1 + $0x88] sm:$0xff] }
  0xea   :  { %v419_v12 = vpop.f32.mrb[7].mxu1 }
  0xeb   :  { %v2187_v19 = vpack.c.bf16 %v1954_v7, %v419_v12  ;;  %2176 = vmatpush3.bf16.msra.mxu0 %v2175_v3  ;;  %2185 = vmatpush3.bf16.msra.mxu1 %v2184_v6  ;;  %v2229_v7 = vpack.c.bf16 %v1756_v1, %v1755_v0  ;;  %v1757_v12 = vld [vmem:[%s2706_s1 + $0x90] sm:$0xff] }
  0xec   :  { %2186 = vmatprep.subr.bf16.mxu1 %v2299_v36  ;;  %2190 = vmatprep.subr.bf16.mxu0 %v2189_v5  ;;  %v2233_v32 = vpack.c.bf16 %v1758_v13, %v1757_v12 }
  0xee   :  { %1972 = vmatmul.mubr.msk.f32.vlgmr.msra.gmra.mrb[8].mxu0 %vm468_vm2, %v452_v22 }
  0xef   :  { %2188 = vmatpush3.bf16.msra.mxu1 %v2187_v19  ;;  %2192 = vmatpush3.bf16.msra.mxu0 %v2189_v5  ;;  %v1760_v19 = vld [vmem:[%s2706_s1 + $0xa8] sm:$0xff]  ;;  %s2302_s1 = smov [#allocation2]  }
  0xf0   :  { %1997 = vmatprep.mubr.msk.f32.mxu0 %vm39_vm0, %v2334_v2  ;;  %2194 = vmatprep.subr.bf16.mxu1 %v2193_v27  ;;  %s1692_s28 = sshll.u32 %s2302_s1, 4  ;;  %s1693_s28 = int_to_ptr.vmem [resolvable:$true] %s1692_s28 }
  0xf1   :  { %2198 = vmatprep.subr.bf16.mxu0 %v2197_v31  ;;  %s2275_s29 = scalar_lea.vmem %s1693_s28, 768  ;;  %p2280_p1 = scmp.lt.s32.totalorder %s1693_s28, %s1693_s28 }
  0xf2   :  { %1991 = vmatmul.mubr.msk.f32.vlgmr.msra.gmra.mrb[8].mxu1 %vm468_vm2, %v452_v22  ;;  %1998 = vmatmul.mubr.msk.f32.vlgmr.msra.gmra.mrb[10].mxu0 %vm39_vm0, %v2360_v11  ;;  %p2276_p0 = scmp.ne.s32.totalorder %s1693_s28, %s2275_s29  ;;  %p2281_p2 = scmp.lt.s32.totalorder %s2275_s29, %s2275_s29 }
  0xf3   :  { %2196 = vmatpush3.bf16.msra.mxu1 %v2193_v27  ;;  %2200 = vmatpush3.bf16.msra.mxu0 %v2197_v31  ;;  %v989_v27 = vpop.trf.xlu1 }
  0xf4   :  { %2000 = vmatprep.mubr.msk.f32.mxu0 %vm39_vm0, %v2371_v14  ;;  %2007 = vmatprep.mubr.msk.f32.mxu1 %vm39_vm0, %v2353_v9  ;;  %p2282_p3 = por %p2281_p2, %p2280_p1 }
  0xf5   :  { %2202 = vmatprep.subr.bf16.mxu1 %v2201_v34  ;;  %2205 = vmatprep.subr.bf16.mxu0 %v2299_v36 }
  0xf6   :  { %2001 = vmatmul.mubr.msk.f32.gmra.mrb[12].mxu0 %vm39_vm0, %v2390_v18  ;;  %2008 = vmatmul.mubr.msk.f32.vlgmr.msra.gmra.mrb[10].mxu1 %vm39_vm0, %v2376_v16  ;;  %p2283_p4 = pnand %p2282_p3, %p2276_p0 }
  0xf7   :  { %2204 = vmatpush3.bf16.msra.mxu1 %v2201_v34  ;;  %2010 = vmatprep.mubr.msk.f32.mxu1 %vm39_vm0, %v2383_v17  ;;  %v2237_v34 = vpack.c.bf16 %v1760_v19, %v1759_v15 }
  0xf8   :  { %2017 = vmatprep.mubr.msk.f32.mxu0 %vm39_vm0, %v2400_v20  ;;  %2217 = vmatprep.subr.bf16.mxu1 %v2299_v36 }
  0xfa   :  { %2011 = vmatmul.mubr.msk.f32.gmra.mrb[12].mxu1 %vm39_vm0, %v2407_v21  ;;  %2018 = vmatmul.mubr.msk.f32.vlgmr.msra.gmra.mrb[14].mxu0 %vm39_vm0, %v2424_v24 }
  0xfb   :  { %2020 = vmatprep.mubr.msk.f32.mxu0 %vm39_vm0, %v2431_v25  ;;  %2027 = vmatprep.mubr.msk.f32.mxu1 %vm39_vm0, %v2417_v23 }
  0xfe   :  { %2021 = vmatmul.mubr.msk.f32.gmra.mrb[16].mxu0 %vm39_vm0, %v2455_v29  ;;  %2028 = vmatmul.mubr.msk.f32.vlgmr.msra.gmra.mrb[14].mxu1 %vm39_vm0, %v2438_v26 }
  0xff   :  { %2030 = vmatprep.mubr.msk.f32.mxu1 %vm39_vm0, %v2448_v28  ;;  %2049 = vmatprep.mubr.msk.f32.mxu0 %vm2300_vm1, %v2301_v37 }
 0x102   :  { %2031 = vmatmul.mubr.msk.f32.gmra.mrb[16].mxu1 %vm39_vm0, %v2464_v30 }
 0x103   :  { %2068 = vmatprep.mubr.msk.f32.mxu1 %vm2300_vm1, %v2301_v37 }
 0x1c1   :  { %v538_v45 = vpop.f32.mrb[8].mxu0 }
 0x1c2   :  { %613 = vst.msk [vmem:[#allocation2] sm:$0xff] %vm612_vm3, %v538_v45  ;;  %v1973_v46 = vpop.f32.mrb[9].mxu0 }
 0x1c5   :  { %v608_v47 = vpop.f32.mrb[8].mxu1  ;;  %v1999_v48 = vpop.f32.mrb[10].mxu0 }
 0x1c6   :  { %614 = vst.msk [vmem:[#allocation2 + $0x8] sm:$0xff] %vm612_vm3, %v608_v47  ;;  %v1992_v49 = vpop.f32.mrb[9].mxu1  ;;  %v690_v50 = vpop.f32.mrb[11].mxu0 }
 0x1c7   :  { %v2206_v51 = vpack.c.bf16 %v1999_v48, %v690_v50  ;;  %v1525_v49 = vpop.trf.xlu0 }
 0x1c9   :  { %v2002_v52 = vpop.f32.mrb[12].mxu0  ;;  %v2009_v53 = vpop.f32.mrb[10].mxu1  ;;  %2207 = vmatpush3.bf16.msra.mxu0 %v2206_v51 }
 0x1ca   :  { %v700_v54 = vpop.f32.mrb[13].mxu0  ;;  %v775_v55 = vpop.f32.mrb[11].mxu1  ;;  %2208 = vmatprep.subr.bf16.mxu0 %v2299_v36 }
 0x1cb   :  { %v2218_v56 = vpack.c.bf16 %v2002_v52, %v700_v54  ;;  %v2209_v57 = vpack.c.bf16 %v2009_v53, %v775_v55 }
 0x1cd   :  { %v2012_v58 = vpop.f32.mrb[12].mxu1  ;;  %v2019_v59 = vpop.f32.mrb[14].mxu0  ;;  %2210 = vmatpush3.bf16.msra.mxu0 %v2209_v57  ;;  %2219 = vmatpush3.bf16.msra.mxu1 %v2218_v56 }
 0x1ce   :  { %v785_v60 = vpop.f32.mrb[13].mxu1  ;;  %v860_v61 = vpop.f32.mrb[15].mxu0  ;;  %2211 = vmatprep.subr.bf16.mxu0 %v2299_v36  ;;  %2220 = vmatprep.subr.bf16.mxu1 %v2299_v36 }
 0x1cf   :  { %v2221_v62 = vpack.c.bf16 %v2012_v58, %v785_v60  ;;  %v2212_v63 = vpack.c.bf16 %v2019_v59, %v860_v61 }
 0x1d1   :  { %v2022_v3 = vpop.f32.mrb[16].mxu0  ;;  %v2029_v4 = vpop.f32.mrb[14].mxu1  ;;  %2213 = vmatpush3.bf16.msra.mxu0 %v2212_v63  ;;  %2222 = vmatpush3.bf16.msra.mxu1 %v2221_v62 }
 0x1d2   :  { %v870_v5 = vpop.f32.mrb[17].mxu0  ;;  %v945_v6 = vpop.f32.mrb[15].mxu1  ;;  %2214 = vmatprep.subr.bf16.mxu0 %v2299_v36  ;;  %2223 = vmatprep.subr.bf16.mxu1 %v2299_v36 }
 0x1d3   :  { %v2224_v8 = vpack.c.bf16 %v2022_v3, %v870_v5  ;;  %v2215_v10 = vpack.c.bf16 %v2029_v4, %v945_v6 }
 0x1d5   :  { %v2032_v22 = vpop.f32.mrb[16].mxu1  ;;  %2216 = vmatpush3.bf16.msra.mxu0 %v2215_v10  ;;  %2225 = vmatpush3.bf16.msra.mxu1 %v2224_v8 }
 0x1d6   :  { %v955_v31 = vpop.f32.mrb[17].mxu1  ;;  %2226 = vmatprep.subr.bf16.mxu1 %v2299_v36  ;;  %2230 = vmatprep.subr.bf16.mxu0 %v2229_v7 }
 0x1d7   :  { %v2227_v33 = vpack.c.bf16 %v2032_v22, %v955_v31 }
 0x1d8   :  { %2050 = vmatmul.mubr.msk.f32.vlgmr.msra.gmra.mrb[18].mxu0 %vm468_vm2, %v989_v27 }
 0x1d9   :  { %2228 = vmatpush3.bf16.msra.mxu1 %v2227_v33  ;;  %2232 = vmatpush3.bf16.msra.mxu0 %v2229_v7 }
 0x1da   :  { %2075 = vmatprep.mubr.msk.f32.mxu0 %vm39_vm0, %v2334_v2  ;;  %2234 = vmatprep.subr.bf16.mxu1 %v2233_v32 }
 0x1db   :  { %2238 = vmatprep.subr.bf16.mxu0 %v2237_v34 }
 0x1dc   :  { %2069 = vmatmul.mubr.msk.f32.vlgmr.msra.gmra.mrb[18].mxu1 %vm468_vm2, %v989_v27  ;;  %2076 = vmatmul.mubr.msk.f32.vlgmr.msra.gmra.mrb[20].mxu0 %vm39_vm0, %v2360_v11 }
 0x1dd   :  { %2236 = vmatpush3.bf16.msra.mxu1 %v2233_v32  ;;  %2240 = vmatpush3.bf16.msra.mxu0 %v2237_v34 }
 0x1de   :  { %2078 = vmatprep.mubr.msk.f32.mxu0 %vm39_vm0, %v2371_v14  ;;  %2085 = vmatprep.mubr.msk.f32.mxu1 %vm39_vm0, %v2353_v9 }
 0x1df   :  { %2242 = vmatprep.subr.bf16.mxu1 %v2241_v39  ;;  %2245 = vmatprep.subr.bf16.mxu0 %v2299_v36 }
 0x1e0   :  { %2079 = vmatmul.mubr.msk.f32.gmra.mrb[22].mxu0 %vm39_vm0, %v2390_v18  ;;  %2086 = vmatmul.mubr.msk.f32.vlgmr.msra.gmra.mrb[20].mxu1 %vm39_vm0, %v2376_v16 }
 0x1e1   :  { %2244 = vmatpush3.bf16.msra.mxu1 %v2241_v39  ;;  %2088 = vmatprep.mubr.msk.f32.mxu1 %vm39_vm0, %v2383_v17 }
 0x1e2   :  { %2095 = vmatprep.mubr.msk.f32.mxu0 %vm39_vm0, %v2400_v20  ;;  %2257 = vmatprep.subr.bf16.mxu1 %v2299_v36 }
 0x1e4   :  { %2089 = vmatmul.mubr.msk.f32.gmra.mrb[22].mxu1 %vm39_vm0, %v2407_v21  ;;  %2096 = vmatmul.mubr.msk.f32.vlgmr.msra.gmra.mrb[24].mxu0 %vm39_vm0, %v2424_v24 }
 0x1e5   :  { %2098 = vmatprep.mubr.msk.f32.mxu0 %vm39_vm0, %v2431_v25  ;;  %2105 = vmatprep.mubr.msk.f32.mxu1 %vm39_vm0, %v2417_v23 }
 0x1e8   :  { %2099 = vmatmul.mubr.msk.f32.gmra.mrb[26].mxu0 %vm39_vm0, %v2455_v29  ;;  %2106 = vmatmul.mubr.msk.f32.vlgmr.msra.gmra.mrb[24].mxu1 %vm39_vm0, %v2438_v26 }
 0x1e9   :  { %2108 = vmatprep.mubr.msk.f32.mxu1 %vm39_vm0, %v2448_v28  ;;  %2127 = vmatprep.mubr.msk.f32.mxu0 %vm2300_vm1, %v2301_v37 }
 0x1ec   :  { %2109 = vmatmul.mubr.msk.f32.gmra.mrb[26].mxu1 %vm39_vm0, %v2464_v30 }
 0x1ed   :  { %2146 = vmatprep.mubr.msk.f32.mxu1 %vm2300_vm1, %v2301_v37 }
 0x2ab   :  { %v1074_v2 = vpop.f32.mrb[18].mxu0 }
 0x2ac   :  { %1149 = vst.msk [vmem:[#allocation2 + $0x10] sm:$0xff] %vm612_vm3, %v1074_v2  ;;  %v2051_v9 = vpop.f32.mrb[19].mxu0 }
 0x2af   :  { %v1144_v11 = vpop.f32.mrb[18].mxu1  ;;  %v2077_v14 = vpop.f32.mrb[20].mxu0 }
 0x2b0   :  { %1150 = vst.msk [vmem:[#allocation2 + $0x18] sm:$0xff] %vm612_vm3, %v1144_v11  ;;  %v2070_v16 = vpop.f32.mrb[19].mxu1  ;;  %v1226_v17 = vpop.f32.mrb[21].mxu0 }
 0x2b1   :  { %v2246_v18 = vpack.c.bf16 %v2077_v14, %v1226_v17 }
 0x2b3   :  { %v2080_v20 = vpop.f32.mrb[22].mxu0  ;;  %v2087_v21 = vpop.f32.mrb[20].mxu1  ;;  %2247 = vmatpush3.bf16.msra.mxu0 %v2246_v18 }
 0x2b4   :  { %v1236_v23 = vpop.f32.mrb[23].mxu0  ;;  %v1311_v24 = vpop.f32.mrb[21].mxu1  ;;  %2248 = vmatprep.subr.bf16.mxu0 %v2299_v36 }
 0x2b5   :  { %v2258_v25 = vpack.c.bf16 %v2080_v20, %v1236_v23  ;;  %v2249_v26 = vpack.c.bf16 %v2087_v21, %v1311_v24 }
 0x2b7   :  { %v2090_v28 = vpop.f32.mrb[22].mxu1  ;;  %v2097_v29 = vpop.f32.mrb[24].mxu0  ;;  %2250 = vmatpush3.bf16.msra.mxu0 %v2249_v26  ;;  %2259 = vmatpush3.bf16.msra.mxu1 %v2258_v25 }
 0x2b8   :  { %v1321_v30 = vpop.f32.mrb[23].mxu1  ;;  %v1396_v37 = vpop.f32.mrb[25].mxu0  ;;  %2251 = vmatprep.subr.bf16.mxu0 %v2299_v36  ;;  %2260 = vmatprep.subr.bf16.mxu1 %v2299_v36 }
 0x2b9   :  { %v2261_v40 = vpack.c.bf16 %v2090_v28, %v1321_v30  ;;  %v2252_v41 = vpack.c.bf16 %v2097_v29, %v1396_v37 }
 0x2bb   :  { %v2100_v42 = vpop.f32.mrb[26].mxu0  ;;  %v2107_v43 = vpop.f32.mrb[24].mxu1  ;;  %2253 = vmatpush3.bf16.msra.mxu0 %v2252_v41  ;;  %2262 = vmatpush3.bf16.msra.mxu1 %v2261_v40 }
 0x2bc   :  { %v1406_v44 = vpop.f32.mrb[27].mxu0  ;;  %v1481_v45 = vpop.f32.mrb[25].mxu1  ;;  %2254 = vmatprep.subr.bf16.mxu0 %v2299_v36  ;;  %2263 = vmatprep.subr.bf16.mxu1 %v2299_v36 }
 0x2bd   :  { %v2264_v46 = vpack.c.bf16 %v2100_v42, %v1406_v44  ;;  %v2255_v47 = vpack.c.bf16 %v2107_v43, %v1481_v45 }
 0x2bf   :  { %v2110_v48 = vpop.f32.mrb[26].mxu1  ;;  %2256 = vmatpush3.bf16.msra.mxu0 %v2255_v47  ;;  %2265 = vmatpush3.bf16.msra.mxu1 %v2264_v46 }
 0x2c0   :  { %v1491_v50 = vpop.f32.mrb[27].mxu1  ;;  %2266 = vmatprep.subr.bf16.mxu1 %v2299_v36 }
 0x2c1   :  { %v2267_v51 = vpack.c.bf16 %v2110_v48, %v1491_v50 }
 0x2c2   :  { %2128 = vmatmul.mubr.msk.f32.vlgmr.msra.gmra.mrb[28].mxu0 %vm468_vm2, %v1525_v49 }
 0x2c3   :  { %2268 = vmatpush3.bf16.msra.mxu1 %v2267_v51 }
 0x2c6   :  { %2147 = vmatmul.mubr.msk.f32.vlgmr.msra.gmra.mrb[28].mxu1 %vm468_vm2, %v1525_v49 }
 0x395   :  { %v1610_v52 = vpop.f32.mrb[28].mxu0 }
 0x396   :  { %1685 = vst.msk [vmem:[#allocation2 + $0x20] sm:$0xff] %vm612_vm3, %v1610_v52  ;;  %v2129_v53 = vpop.f32.mrb[29].mxu0 }
 0x399   :  { %v1680_v54 = vpop.f32.mrb[28].mxu1 }
 0x39a   :  { %1686 = vst.msk [vmem:[#allocation2 + $0x28] sm:$0xff] %vm612_vm3, %v1680_v54  ;;  %v2148_v55 = vpop.f32.mrb[29].mxu1 }
 0x39b   :  { %2286 = shalt.err (!%p2283_p4)
}
 0x39c   :  { %s2287_s5 = scalar_lea.hbm %s2708_s3, 768 }
 0x39d   :  { %p2288_p5 = scmp.ne.s32.totalorder %s2708_s3, %s2287_s5  ;;  %p2291_p6 = scmp.lt.u32.totalorder %s2287_s5, %s2708_s3 }
 0x39f   :  { %p2293_p7 = pnand %p2291_p6, %p2288_p5 }
 0x3a1   :  { %2296 = shalt.err (!%p2293_p7)
}
 0x3a2   :  { %s2303_s10 = smov 128   ;;  %s2304_s11 = smov 8  }
 0x3a3   :  { %1698 = dma.vmem_to_hbm [thread:$0]  %s1693_s28, 768, %s2708_s3, [#allocation3], %s2303_s10, %s2303_s10, %s2304_s11  }
 0x3a4   :  { %2297 = dma.done.wait [#allocation3], 768  }
 0x3a5   :  { %2298 = vsyncadd [#allocation3], 4294966528 }
 0x3a6   :  { %1702 = vsyncpa [#allocation3], 1 }

</bundles_post_ra>
